<compile_context>
chip_gen: v7x
topology: tpu7x:2x2x1
jax: 0.10.0
libtpu: 0.0.40
codegen_flags: <defaults>
</compile_context>

<pallas_src>
import functools
import math

import jax
import jax.numpy as jnp
from jax.experimental import pallas as pl
from jax.experimental.pallas import tpu as pltpu


# ----------------------------------------------------------------------------
# helpers
# ----------------------------------------------------------------------------
def _round_up(n, m):
    return ((n + m - 1) // m) * m


def _choose_token_tile(T, V, D, itemsize, max_tile=1024, vmem_budget=28 << 20):
    """Largest power-of-two token tile whose working set fits the VMEM budget.

    Budget assumes the table is double-buffered (conservative) plus the
    double-buffered output tile and ids tile.  28 MiB keeps us under the
    32 MiB default scoped limit on every generation (v7x is the tightest:
    64 MiB physical / 32 MiB scoped).
    """
    table_bytes = 2 * V * D * itemsize
    tile = max_tile
    while tile > 8:
        need = table_bytes + 2 * tile * D * itemsize + 2 * tile * 4
        if need <= vmem_budget:
            break
        tile //= 2
    # No point tiling wider than the (8-aligned) token count.
    tile = min(tile, _round_up(T, 8))
    return max(tile, 8)


# ----------------------------------------------------------------------------
# small-vocab path: one-hot x table on the MXU
# ----------------------------------------------------------------------------
def _onehot_embed_kernel(ids_ref, table_ref, out_ref, *, vocab_size, scale):
    # ids_ref:   (TT, 1) int32    current token tile
    # table_ref: (V,  D) float    full embedding table (resident every step)
    # out_ref:   (TT, D) float
    ids = ids_ref[...]                                              # (TT, 1)
    tt = ids.shape[0]
    iota = jax.lax.broadcasted_iota(jnp.int32, (tt, vocab_size), 1)
    # Fold sqrt(dim_model) into the one-hot (kept in f32) so the scale is
    # applied inside the MXU accumulation instead of a VPU pass over (TT, D).
    one_hot = jnp.where(iota == ids, jnp.float32(scale), jnp.float32(0.0))
    emb = jnp.dot(one_hot, table_ref[...].astype(jnp.float32),
                  preferred_element_type=jnp.float32)               # (TT, D)
    out_ref[...] = emb.astype(out_ref.dtype)


def _word_embd_onehot(ids, table, scale, token_tile=None):
    T = ids.shape[0]
    V, D = table.shape
    itemsize = jnp.dtype(table.dtype).itemsize
    if token_tile is None:
        token_tile = _choose_token_tile(T, V, D, itemsize)

    # Pad the token axis so the grid tiles it exactly; tail is sliced off.
    T_pad = _round_up(T, token_tile)
    ids2 = jnp.pad(ids, (0, T_pad - T)).reshape(T_pad, 1)
    grid = (T_pad // token_tile,)

    kernel = functools.partial(_onehot_embed_kernel, vocab_size=V, scale=scale)

    # Explicit VMEM budget (matters on v7x: 64 MiB physical, 32 MiB scoped).
    vmem_need = (2 * V * D * itemsize
                 + 2 * token_tile * D * itemsize
                 + 2 * token_tile * 4)
    compiler_kwargs = dict(dimension_semantics=("parallel",))
    if vmem_need > (28 << 20):
        compiler_kwargs["vmem_limit_bytes"] = min(int(vmem_need * 1.25), 60 << 20)

    cost = pl.CostEstimate(
        flops=2 * T_pad * V * D,
        transcendentals=0,
        bytes_accessed=(T_pad * D * itemsize       # output write
                        + V * D * itemsize         # table read
                        + T_pad * 4),              # ids read
    )

    out_flat = pl.pallas_call(
        kernel,
        out_shape=jax.ShapeDtypeStruct((T_pad, D), table.dtype),
        grid_spec=pltpu.PrefetchScalarGridSpec(
            num_scalar_prefetch=0,
            grid=grid,
            in_specs=[
                # token-id tile: (token_tile, 1)
                pl.BlockSpec((token_tile, 1), lambda i: (i, 0)),
                # full embedding table, same block every step
                pl.BlockSpec((V, D), lambda i: (0, 0)),
            ],
            out_specs=pl.BlockSpec((token_tile, D), lambda i: (i, 0)),
        ),
        compiler_params=pltpu.CompilerParams(**compiler_kwargs),
        cost_estimate=cost,
    )(ids2, table)
    return out_flat


# ----------------------------------------------------------------------------
# large-vocab path: scalar-prefetch row gather (no table residency in VMEM)
# ----------------------------------------------------------------------------
def _gather_embed_kernel(ids_ref, row_ref, out_ref, *, scale):
    # ids_ref: (T,) int32 in SMEM (scalar prefetch; consumed by the index_map)
    # row_ref: (1, 1, D) gathered embedding row for this token
    # out_ref: (1, 1, D)
    del ids_ref
    out_ref[...] = (row_ref[...].astype(jnp.float32)
                    * jnp.float32(scale)).astype(out_ref.dtype)


def _word_embd_gather(ids, table, scale):
    T = ids.shape[0]
    V, D = table.shape
    itemsize = jnp.dtype(table.dtype).itemsize
    # (V, 1, D) so the (1, 1, D) row block matches the array's last two dims.
    table_3d = table.reshape(V, 1, D)

    kernel = functools.partial(_gather_embed_kernel, scale=scale)
    cost = pl.CostEstimate(
        flops=T * D,
        transcendentals=0,
        bytes_accessed=2 * T * D * itemsize + T * 4,
    )

    out = pl.pallas_call(
        kernel,
        out_shape=jax.ShapeDtypeStruct((T, 1, D), table.dtype),
        grid_spec=pltpu.PrefetchScalarGridSpec(
            num_scalar_prefetch=1,          # ids -> SMEM, visible to index_maps
            grid=(T,),
            in_specs=[
                # gather: block row index comes from the prefetched ids
                pl.BlockSpec((1, 1, D), lambda i, ids_ref: (ids_ref[i], 0, 0)),
            ],
            out_specs=pl.BlockSpec((1, 1, D), lambda i, ids_ref: (i, 0, 0)),
        ),
        compiler_params=pltpu.CompilerParams(
            dimension_semantics=("arbitrary",)),
        cost_estimate=cost,
    )(ids, table_3d)
    return out.reshape(T, D)


# ----------------------------------------------------------------------------
# public wrapper
# ----------------------------------------------------------------------------
def word_embd(x, table, *, token_tile=None, force_gather=False):
    """x: (B, S) integer token ids; table: (V, D) embedding weight.

    Returns (B, S, D) = table[x] * sqrt(D), matching WordEmbd.forward.
    """
    B, S = x.shape
    V, D = table.shape
    scale = math.sqrt(float(D))           # dim_model == D
    itemsize = jnp.dtype(table.dtype).itemsize

    # Clamp ids so out-of-range tokens have defined behavior (PyTorch errors).
    ids = jnp.clip(x.reshape(-1).astype(jnp.int32), 0, V - 1)
    T = ids.shape[0]

    # Dispatch: one-hot MXU path only while the table comfortably fits VMEM.
    table_bytes = V * D * itemsize
    use_gather = force_gather or table_bytes > (8 << 20) or V > 8192

    if use_gather:
        out_flat = _word_embd_gather(ids, table, scale)
    else:
        out_flat = _word_embd_onehot(ids, table, scale, token_tile)

    return out_flat[:T].reshape(B, S, D)


if __name__ == "__main__":
    # Module hyper-params (small, consistent with the forward semantics).
    vocab_size = 32
    dim_model = 128
    batch, seq = 2, 8

    key = jax.random.PRNGKey(0)
    k_tbl, k_ids = jax.random.split(key)

    # Synthetic nn.Embedding weight (N(0, 1), like torch default init).
    table = jax.random.normal(k_tbl, (vocab_size, dim_model), dtype=jnp.float32)
    x = jax.random.randint(k_ids, (batch, seq), 0, vocab_size, dtype=jnp.int32)

    ref = jnp.take(table, x, axis=0) * math.sqrt(dim_model)

    # Fast path (one-hot x table on the MXU, scale folded into the one-hot).
    out = jax.block_until_ready(word_embd(x, table))
    assert out.shape == (batch, seq, dim_model)
    assert jnp.allclose(out, ref, atol=1e-5, rtol=1e-5)

    # Scalable path (scalar-prefetch row gather) exercised on the same inputs.
    out_g = jax.block_until_ready(word_embd(x, table, force_gather=True))
    assert out_g.shape == (batch, seq, dim_model)
    assert jnp.allclose(out_g, ref, atol=1e-5, rtol=1e-5)

    print("KERNEL_OK")
</pallas_src>

<mosaic_0001>
module attributes {stable_mosaic.version = 11 : i64} {
  func.func @_onehot_embed_kernel(%arg0: i32, %arg1: memref<16x1xi32, #tpu.memory_space<vmem>>, %arg2: memref<32x128xf32, #tpu.memory_space<vmem>>, %arg3: memref<16x128xf32, #tpu.memory_space<vmem>>) attributes {dimension_semantics = [#tpu.dimension_semantics<parallel>], iteration_bounds = array<i64: 1>, scalar_prefetch = 0 : i64, scratch_operands = 0 : i64, tpu.core_type = #tpu.core_type<tc>, window_params = [{transform_indices = @transform_0, window_bounds = array<i64: 16, 1>}, {pipeline_mode = #tpu.pipeline_mode<synchronous>, transform_indices = @transform_1, window_bounds = array<i64: 32, 128>}, {transform_indices = @transform_2, window_bounds = array<i64: 16, 128>}]} {
    %c0 = arith.constant 0 : index
    %c0_0 = arith.constant 0 : index
    %0 = vector.load %arg1[%c0, %c0_0] : memref<16x1xi32, #tpu.memory_space<vmem>>, vector<16x1xi32>
    %1 = tpu.iota {dimensions = array<i32: 1>} : vector<16x32xi32>
    %2 = vector.broadcast %0 : vector<16x1xi32> to vector<16x32xi32>
    %3 = arith.cmpi eq, %1, %2 : vector<16x32xi32>
    %cst = arith.constant 11.3137083 : f32
    %cst_1 = arith.constant 0.000000e+00 : f32
    %4 = vector.broadcast %cst : f32 to vector<16x32xf32>
    %5 = vector.broadcast %cst_1 : f32 to vector<16x32xf32>
    %6 = arith.select %3, %4, %5 : vector<16x32xi1>, vector<16x32xf32>
    %c0_2 = arith.constant 0 : index
    %c0_3 = arith.constant 0 : index
    %7 = vector.load %arg2[%c0_2, %c0_3] : memref<32x128xf32, #tpu.memory_space<vmem>>, vector<32x128xf32>
    %cst_4 = arith.constant dense<0.000000e+00> : vector<16x128xf32>
    %8 = tpu.matmul %6, %7, %cst_4 {dimension_numbers = #tpu.dot_dimension_numbers<[1], [0], [0], [1], [0, 0, 1, 1], [], []>} : vector<16x32xf32>, vector<32x128xf32>, vector<16x128xf32> -> vector<16x128xf32>
    %c0_5 = arith.constant 0 : index
    %c0_6 = arith.constant 0 : index
    %9 = vector.load %arg3[%c0_5, %c0_6] : memref<16x128xf32, #tpu.memory_space<vmem>>, vector<16x128xf32>
    tpu.vector_store %arg3[%c0_5, %c0_6], %8 {strides = array<i32>} : memref<16x128xf32, #tpu.memory_space<vmem>>, vector<16x128xf32>,
    return
  }
  func.func @transform_0(%arg0: i32) -> (i32, i32) {
    %c0_i32 = arith.constant 0 : i32
    %c0_i32_0 = arith.constant 0 : i32
    return %arg0, %c0_i32 : i32, i32
  }
  func.func @transform_1(%arg0: i32) -> (i32, i32) {
    %c0_i32 = arith.constant 0 : i32
    %c0_i32_0 = arith.constant 0 : i32
    %c0_i32_1 = arith.constant 0 : i32
    return %c0_i32, %c0_i32_0 : i32, i32
  }
  func.func @transform_2(%arg0: i32) -> (i32, i32) {
    %c0_i32 = arith.constant 0 : i32
    %c0_i32_0 = arith.constant 0 : i32
    return %arg0, %c0_i32 : i32, i32
  }
}

</mosaic_0001>

<bundles_post_ra>
// kernel: tpu_custom_call.1
= control target key start
LH: loop header
LB: loop body
LE: loop exit
PB: predicated region body
PF: predicated region fallthrough
CT: control target
= control target key end

     0   :  { %7 = vsyncpa [#allocation3], 0  ;;  %s284_s0 = inlined_call_operand.vmem [shape: s32[16,1], index: 0, kind: input, shape index: {}]   ;;  %s285_s1 = inlined_call_operand.hbm [shape: f32[32,128], index: 1, kind: input, shape index: {}]   ;;  %s286_s2 = inlined_call_operand.hbm [shape: f32[16,128], index: 2, kind: output, shape index: {}]  }
   0x1   :  { %8 = vsyncpa [#allocation4], 0  ;;  %s227_s9 = smov [#allocation2]   ;;  %s179_s13 = scalar_lea.hbm %s285_s1, 512 }
   0x2   :  { %s16_s10 = sshll.u32 %s227_s9, 4  ;;  %p180_p0 = scmp.ne.s32.totalorder %s285_s1, %s179_s13  ;;  %s17_s10 = int_to_ptr.vmem [resolvable:$true] %s16_s10 }
   0x3   :  { %p183_p1 = scmp.lt.u32.totalorder %s179_s13, %s285_s1 }
   0x5   :  { %p185_p2 = pnand %p183_p1, %p180_p0 }
   0x7   :  { %188 = shalt.err (!%p185_p2)
}
   0x8   :  { %s189_s18 = scalar_lea.vmem %s17_s10, 512  ;;  %p194_p4 = scmp.lt.s32.totalorder %s17_s10, %s17_s10 }
   0x9   :  { %p190_p3 = scmp.ne.s32.totalorder %s17_s10, %s189_s18  ;;  %p195_p5 = scmp.lt.s32.totalorder %s189_s18, %s189_s18 }
   0xb   :  { %p196_p6 = por %p195_p5, %p194_p4 }
   0xd   :  { %p197_p7 = pnand %p196_p6, %p190_p3 }
   0xf   :  { %200 = shalt.err (!%p197_p7)
}
  0x10   :  { %s228_s19 = smov 128   ;;  %s229_s20 = smov 8  }
  0x11   :  { %22 = dma.hbm_to_vmem [thread:$0]  %s285_s1, 512, %s17_s10, [#allocation3], %s228_s19, %s228_s19, %s229_s20  }
  0x12   :  { %223 = dma.done.wait [#allocation3], 512  }
  0x13   :  { %224 = vsyncadd [#allocation3], 4294966784  ;;  %v230_v0 = vmov 0   ;;  %v26_v1 = vld [vmem:[%s284_s0] sm:$0xff]  ;;  %v41_v3 = vld [vmem:[#allocation2 + $0x8] sm:$0xff]  ;;  %v28_v9 = vlaneseq  ;;  %vm44_vm0 = vcmask 261120  }
  0x14   :  { %178 = vset.pattern.permute.xlu0 %v230_v0  ;;  %v40_v2 = vld [vmem:[#allocation2] sm:$0xff]  ;;  %v42_v4 = vld [vmem:[#allocation2 + $0x10] sm:$0xff]  ;;  %v43_v5 = vld [vmem:[#allocation2 + $0x18] sm:$0xff]  ;;  %v231_v12 = vmov 0.0  }
  0x15   :  { %31 = vperm.xlu0 %178, %v26_v1   ;;  %v27_v6 = vld [vmem:[%s284_s0 + $0x8] sm:$0xff]  ;;  %v164_v7 = vpack.c.bf16 %v41_v3, %v40_v2  ;;  %v168_v8 = vpack.c.bf16 %v43_v5, %v42_v4  ;;  %v29_v10 = vand.u32 127, %v28_v9  ;;  %s232_s0 = smov [#allocation5]  }
  0x16   :  { %s133_s1 = sshll.u32 %s232_s0, 4  ;;  %s134_s1 = int_to_ptr.vmem [resolvable:$true] %s133_s1 }
  0x17   :  { %165 = vmatprep.subr.bf16.mxu0 %v164_v7  ;;  %s201_s27 = scalar_lea.vmem %s134_s1, 256  ;;  %p206_p9 = scmp.lt.s32.totalorder %s134_s1, %s134_s1 }
  0x18   :  { %167 = vmatpush3.bf16.msra.mxu0 %v164_v7  ;;  %p202_p8 = scmp.ne.s32.totalorder %s134_s1, %s201_s27  ;;  %p207_p10 = scmp.lt.s32.totalorder %s201_s27, %s201_s27 }
  0x19   :  { %34 = vperm.xlu0 %178, %v27_v6   ;;  %169 = vmatprep.subr.bf16.mxu0 %v168_v8 }
  0x1a   :  { %p208_p11 = por %p207_p10, %p206_p9 }
  0x1c   :  { %171 = vmatpush3.bf16.msra.mxu0 %v168_v8  ;;  %p209_p12 = pnand %p208_p11, %p202_p8 }
  0x94   :  { %v32_v11 = vpop.permute.xlu0 %31 }
  0x95   :  { %vm36_vm1 = vcmp.eq.s32.totalorder %v29_v10, %v32_v11 }
  0x96   :  { %v38_v13 = vsel %vm36_vm1, 11.313708, %v231_v12 }
  0x97   :  { %161 = vmatprep.mubr.msk.f32.mxu0 %vm44_vm0, %v38_v13 }
  0x98   :  { %v35_v14 = vpop.permute.xlu0 %34 }
  0x99   :  { %vm37_vm2 = vcmp.eq.s32.totalorder %v29_v10, %v35_v14 }
  0x9a   :  { %v39_v15 = vsel %vm37_vm2, 11.313708, %v231_v12 }
  0x9b   :  { %162 = vmatmul.mubr.msk.f32.vlgmr.msra.gmra.mrb[0].mxu0 %vm44_vm0, %v39_v15 }
 0x16e   :  { %v163_v16 = vpop.f32.mrb[0].mxu0 }
 0x16f   :  { %127 = vst [vmem:[#allocation5 + $0x8] sm:$0xff] %v163_v16  ;;  %v117_v17 = vpop.f32.mrb[1].mxu0 }
 0x170   :  { %126 = vst [vmem:[#allocation5] sm:$0xff] %v117_v17 }
 0x171   :  { %212 = shalt.err (!%p209_p12)
}
 0x172   :  { %s213_s30 = scalar_lea.hbm %s286_s2, 256 }
 0x173   :  { %p214_p13 = scmp.ne.s32.totalorder %s286_s2, %s213_s30  ;;  %p217_p0 = scmp.lt.u32.totalorder %s213_s30, %s286_s2 }
 0x175   :  { %p219_p1 = pnand %p217_p0, %p214_p13 }
 0x177   :  { %222 = shalt.err (!%p219_p1)
}
 0x178   :  { %139 = dma.vmem_to_hbm [thread:$0]  %s134_s1, 256, %s286_s2, [#allocation4], %s228_s19, %s228_s19, %s229_s20  }
 0x179   :  { %225 = dma.done.wait [#allocation4], 256  }
 0x17a   :  { %226 = vsyncadd [#allocation4], 4294967040 }
 0x17b   :  { %143 = vsyncpa [#allocation3], 1 }
 0x17c   :  { %144 = vsyncpa [#allocation4], 1 }

</bundles_post_ra>
